<compile_context>
chip_gen: v7x
topology: tpu7x:2x2x1
jax: 0.10.0
libtpu: 0.0.40
codegen_flags: <defaults>
</compile_context>

<pallas_src>
import functools

import jax
import jax.numpy as jnp
from jax.experimental import pallas as pl
from jax.experimental.pallas import tpu as pltpu

_MIB = 1024 * 1024


def _sublane_multiple(dtype):
    """Minimum channel-block multiple for this dtype (f32: 8, bf16: 16,
    int8/fp8: 32) -- sub-32-bit dtypes pack along sublanes."""
    itemsize = jnp.dtype(dtype).itemsize
    return max(8, 32 // max(itemsize, 1))


def _divisor_candidates(n, multiple_of):
    """Divisors of n that are multiples of `multiple_of`, plus n itself
    (a full-extent block is always legal)."""
    cands = {d for d in range(multiple_of, n + 1, multiple_of) if n % d == 0}
    cands.add(n)
    return sorted(cands)


def _pick_blocks(batch, cpg, length, itemsize, sm, budget, *,
                 chan_read_factor=1, allow_l_tiling=True):
    """Pick (b_blk, c_blk, l_blk) so the largest per-array tile stays under
    `budget` bytes, preferring full-L lane-dense tiles, then large channel
    blocks, then batch blocking; L is only tiled as a last resort."""
    def tile_bytes(b, c, l):
        return b * c * chan_read_factor * l * itemsize

    c_cands = _divisor_candidates(cpg, sm)
    l_cands = _divisor_candidates(length, 128) if allow_l_tiling else [length]

    if tile_bytes(1, cpg, length) <= budget:
        b_blk = 1
        for d in range(2, batch + 1):
            if batch % d == 0 and tile_bytes(d, cpg, length) <= budget:
                b_blk = d
        return b_blk, cpg, length, c_cands, l_cands

    fitting_c = [c for c in c_cands if tile_bytes(1, c, length) <= budget]
    if fitting_c:
        return 1, max(fitting_c), length, c_cands, l_cands

    c_blk = min(c_cands)
    fitting_l = [l for l in l_cands if tile_bytes(1, c_blk, l) <= budget]
    l_blk = max(fitting_l) if fitting_l else min(l_cands)
    return 1, c_blk, l_blk, c_cands, l_cands


def _split_for_megacore(batch, cpg, length, b_blk, c_blk, l_blk,
                        c_cands, l_cands):
    """If the grid collapsed to one step, split one axis so the two
    TensorCores on v7x both get work (a single extra step elsewhere)."""
    if (batch // b_blk) * (cpg // c_blk) * (length // l_blk) >= 2:
        return b_blk, c_blk, l_blk
    b_divs = [d for d in range(1, b_blk) if b_blk % d == 0]
    if b_divs:
        return max(b_divs), c_blk, l_blk
    c_smaller = [c for c in c_cands if c < c_blk]
    if c_smaller:
        return b_blk, max(c_smaller), l_blk
    l_smaller = [l for l in l_cands if l < l_blk]
    if l_smaller:
        return b_blk, c_blk, max(l_smaller)
    return b_blk, c_blk, l_blk


def _copy_kernel(x0_ref, x1_ref, out0_ref, out1_ref):
    # Pure copies: the de-interleave is done entirely by the BlockSpec index
    # maps (strided DMA); no XLU / reshape work in VMEM.
    out0_ref[...] = x0_ref[...]
    out1_ref[...] = x1_ref[...]


def _deinterleave_kernel(x_ref, out0_ref, out1_ref, *, groups):
    # Fallback (L not a multiple of 128): read a contiguous channel block and
    # split groups 0/1 on-chip. xr[b, k, j, :] == x[b, k*groups + j, :].
    x = x_ref[...]
    b_blk, cg, length = x.shape
    xr = x.reshape(b_blk, cg // groups, groups, length)
    out0_ref[...] = xr[:, :, 0, :]
    out1_ref[...] = xr[:, :, 1, :]


def channel_shuffle_1d(x, groups, *, tile_budget_bytes=4 * _MIB,
                       force_fallback=False):
    """ChannelShuffle1D.forward: x (B, C, L) -> (out0, out1), each of shape
    (B, C // groups, L), with out_j[b, k, l] = x[b, k * groups + j, l]."""
    batch, channels, length = x.shape
    assert channels % groups == 0
    assert groups >= 2, "module returns the first two group slices"
    cpg = channels // groups
    itemsize = jnp.dtype(x.dtype).itemsize
    sm = _sublane_multiple(x.dtype)
    out_bytes = batch * cpg * length * itemsize
    out_shape = (jax.ShapeDtypeStruct((batch, cpg, length), x.dtype),
                 jax.ShapeDtypeStruct((batch, cpg, length), x.dtype))

    use_fast = (length % 128 == 0) and not force_fallback

    if use_fast:
        # View x as (B, cpg, groups*L): group j of row (b, k) is the
        # contiguous lane span [j*L, (j+1)*L). Free metadata reshape.
        x_r = x.reshape(batch, cpg, groups * length)
        b_blk, c_blk, l_blk, c_cands, l_cands = _pick_blocks(
            batch, cpg, length, itemsize, sm, tile_budget_bytes)
        b_blk, c_blk, l_blk = _split_for_megacore(
            batch, cpg, length, b_blk, c_blk, l_blk, c_cands, l_cands)
        grid = (batch // b_blk, cpg // c_blk, length // l_blk)
        lpg = length // l_blk  # lane-blocks per group

        def in_map(group):
            def index_map(b, c, l, _g=group, _lpg=lpg):
                return (b, c, _g * _lpg + l)
            return index_map

        blk = (b_blk, c_blk, l_blk)
        in_specs = [pl.BlockSpec(blk, in_map(0)),
                    pl.BlockSpec(blk, in_map(1))]
        out_spec = pl.BlockSpec(blk, lambda b, c, l: (b, c, l))
        out_specs = [out_spec, out_spec]

        tile_bytes = b_blk * c_blk * l_blk * itemsize
        step_bytes = 4 * tile_bytes              # 2 input + 2 output tiles
        bytes_accessed = 4 * out_bytes           # read 2 slices, write 2
        kernel = _copy_kernel
        operands = (x_r, x_r)
        dims = ("parallel", "parallel", "parallel")
    else:
        # TODO(synk): for groups > 2 this path also reads the discarded groups
        # 2..g-1 (BlockSpec cannot express a stride-g channel gather here).
        b_blk, c_blk, l_blk, c_cands, l_cands = _pick_blocks(
            batch, cpg, length, itemsize, sm, tile_budget_bytes,
            chan_read_factor=groups, allow_l_tiling=False)
        b_blk, c_blk, l_blk = _split_for_megacore(
            batch, cpg, length, b_blk, c_blk, l_blk, c_cands, l_cands)
        grid = (batch // b_blk, cpg // c_blk)
        in_specs = [pl.BlockSpec((b_blk, c_blk * groups, length),
                                 lambda b, c: (b, c, 0))]
        out_spec = pl.BlockSpec((b_blk, c_blk, length), lambda b, c: (b, c, 0))
        out_specs = [out_spec, out_spec]

        in_tile = b_blk * c_blk * groups * length * itemsize
        out_tile = b_blk * c_blk * length * itemsize
        step_bytes = in_tile + 2 * out_tile
        bytes_accessed = groups * out_bytes + 2 * out_bytes
        kernel = functools.partial(_deinterleave_kernel, groups=groups)
        operands = (x,)
        dims = ("parallel", "parallel")

    # Double-buffered per-step footprint + slack, never below the smallest
    # default scoped limit (16 MiB, v5e), capped at 40 MiB for v7x's 64 MiB
    # physical VMEM.
    vmem_limit_bytes = int(
        min(40 * _MIB, max(16 * _MIB, 2 * step_bytes + 2 * _MIB)))

    return pl.pallas_call(
        kernel,
        out_shape=out_shape,
        grid_spec=pltpu.PrefetchScalarGridSpec(
            num_scalar_prefetch=0,
            grid=grid,
            in_specs=in_specs,
            out_specs=out_specs,
        ),
        compiler_params=pltpu.CompilerParams(
            dimension_semantics=dims,
            vmem_limit_bytes=vmem_limit_bytes),
        cost_estimate=pl.CostEstimate(
            flops=0, transcendentals=0, bytes_accessed=int(bytes_accessed)),
    )(*operands)


def reference(x, groups):
    """Pure-JAX mirror of the PyTorch forward (reshape/permute/reshape)."""
    batch, channels, length = x.shape
    cpg = channels // groups
    y = x.reshape(batch * cpg, groups, length)
    y = jnp.transpose(y, (1, 0, 2))
    y = y.reshape(groups, batch, cpg, length)
    return y[0], y[1]


if __name__ == "__main__":
    key = jax.random.PRNGKey(0)
    ks = jax.random.split(key, 5)

    def check(x, groups, **kw):
        o0, o1 = channel_shuffle_1d(x, groups, **kw)
        o0 = jax.block_until_ready(o0)
        o1 = jax.block_until_ready(o1)
        r0, r1 = reference(x, groups)
        assert o0.shape == r0.shape and o1.shape == r1.shape
        assert bool(jnp.array_equal(o0, r0)), "out0 mismatch"
        assert bool(jnp.array_equal(o1, r1)), "out1 mismatch"

    # 1. groups=2, f32: fast path (pure strided-DMA copies), grid over batch.
    check(jax.random.normal(ks[0], (2, 32, 256), jnp.float32), groups=2)

    # 2. groups=4, f32: tiny budget forces channel blocking (grid (2, 2, 1));
    #    only groups 0 and 1 are ever read from HBM.
    check(jax.random.normal(ks[1], (2, 64, 128), jnp.float32), groups=4,
          tile_budget_bytes=4 * 1024)

    # 3. bf16: dtype-aware channel block (multiple of 16) + batch blocking.
    check(jax.random.normal(ks[2], (4, 32, 128), jnp.float32)
          .astype(jnp.bfloat16), groups=2)

    # 4. tiny budget forces lane (L) tiling: grid (1, 1, 2).
    check(jax.random.normal(ks[3], (1, 16, 256), jnp.float32), groups=2,
          tile_budget_bytes=4 * 1024)

    # 5. fallback in-kernel de-interleave path (used when L % 128 != 0).
    check(jax.random.normal(ks[4], (2, 32, 256), jnp.float32), groups=2,
          force_fallback=True)

    print("KERNEL_OK")
</pallas_src>

<mosaic_0001>
module attributes {stable_mosaic.version = 11 : i64} {
  func.func @_copy_kernel(%arg0: i32, %arg1: i32, %arg2: i32, %arg3: memref<1x16x256xf32, #tpu.memory_space<vmem>>, %arg4: memref<1x16x256xf32, #tpu.memory_space<vmem>>, %arg5: memref<1x16x256xf32, #tpu.memory_space<vmem>>, %arg6: memref<1x16x256xf32, #tpu.memory_space<vmem>>) attributes {dimension_semantics = [#tpu.dimension_semantics<parallel>, #tpu.dimension_semantics<parallel>, #tpu.dimension_semantics<parallel>], iteration_bounds = array<i64: 2, 1, 1>, scalar_prefetch = 0 : i64, scratch_operands = 0 : i64, tpu.core_type = #tpu.core_type<tc>, window_params = [{transform_indices = @transform_0, window_bounds = array<i64: 1, 16, 256>}, {transform_indices = @transform_1, window_bounds = array<i64: 1, 16, 256>}, {transform_indices = @transform_2, window_bounds = array<i64: 1, 16, 256>}, {transform_indices = @transform_3, window_bounds = array<i64: 1, 16, 256>}]} {
    %c0 = arith.constant 0 : index
    %c0_0 = arith.constant 0 : index
    %c0_1 = arith.constant 0 : index
    %0 = vector.load %arg3[%c0, %c0_0, %c0_1] : memref<1x16x256xf32, #tpu.memory_space<vmem>>, vector<1x16x256xf32>
    %c0_2 = arith.constant 0 : index
    %c0_3 = arith.constant 0 : index
    %c0_4 = arith.constant 0 : index
    %1 = vector.load %arg5[%c0_2, %c0_3, %c0_4] : memref<1x16x256xf32, #tpu.memory_space<vmem>>, vector<1x16x256xf32>
    tpu.vector_store %arg5[%c0_2, %c0_3, %c0_4], %0 {strides = array<i32>} : memref<1x16x256xf32, #tpu.memory_space<vmem>>, vector<1x16x256xf32>,
    %c0_5 = arith.constant 0 : index
    %c0_6 = arith.constant 0 : index
    %c0_7 = arith.constant 0 : index
    %2 = vector.load %arg4[%c0_5, %c0_6, %c0_7] : memref<1x16x256xf32, #tpu.memory_space<vmem>>, vector<1x16x256xf32>
    %c0_8 = arith.constant 0 : index
    %c0_9 = arith.constant 0 : index
    %c0_10 = arith.constant 0 : index
    %3 = vector.load %arg6[%c0_8, %c0_9, %c0_10] : memref<1x16x256xf32, #tpu.memory_space<vmem>>, vector<1x16x256xf32>
    tpu.vector_store %arg6[%c0_8, %c0_9, %c0_10], %2 {strides = array<i32>} : memref<1x16x256xf32, #tpu.memory_space<vmem>>, vector<1x16x256xf32>,
    return
  }
  func.func @transform_0(%arg0: i32, %arg1: i32, %arg2: i32) -> (i32, i32, i32) {
    %c0_i32 = arith.constant 0 : i32
    %0 = arith.addi %c0_i32, %arg2 : i32
    %c0_i32_0 = arith.constant 0 : i32
    return %arg0, %arg1, %0 : i32, i32, i32
  }
  func.func @transform_1(%arg0: i32, %arg1: i32, %arg2: i32) -> (i32, i32, i32) {
    %c1_i32 = arith.constant 1 : i32
    %0 = arith.addi %c1_i32, %arg2 : i32
    %c0_i32 = arith.constant 0 : i32
    return %arg0, %arg1, %0 : i32, i32, i32
  }
  func.func @transform_2(%arg0: i32, %arg1: i32, %arg2: i32) -> (i32, i32, i32) {
    %c0_i32 = arith.constant 0 : i32
    return %arg0, %arg1, %arg2 : i32, i32, i32
  }
  func.func @transform_3(%arg0: i32, %arg1: i32, %arg2: i32) -> (i32, i32, i32) {
    %c0_i32 = arith.constant 0 : i32
    return %arg0, %arg1, %arg2 : i32, i32, i32
  }
}

</mosaic_0001>

<bundles_post_ra>
// kernel: tpu_custom_call.1
= control target key start
LH: loop header
LB: loop body
LE: loop exit
PB: predicated region body
PF: predicated region fallthrough
CT: control target
= control target key end

     0   :  { %s1102_s0 = inlined_call_operand.hbm [shape: f32[2,16,512], index: 0, kind: input, shape index: {}]   ;;  %s1103_s1 = inlined_call_operand.hbm [shape: f32[2,16,512], index: 1, kind: input, shape index: {}]   ;;  %s1104_s2 = inlined_call_operand.hbm [shape: f32[2,16,256], index: 2, kind: output, shape index: {0}]   ;;  %s1105_s3 = inlined_call_operand.hbm [shape: f32[2,16,256], index: 3, kind: output, shape index: {1}]  }
   0x1   :  { %1109 = sst [smem:[#allocation14_spill]] %s1102_s0 }
   0x2   :  { %9 = vsyncpa [#allocation3], 0 }
   0x3   :  { %11 = vsyncpa [#allocation3 + $0x1], 0 }
   0x4   :  { %12 = vsyncpa [#allocation6], 0 }
   0x5   :  { %14 = vsyncpa [#allocation6 + $0x1], 0 }
   0x6   :  { %15 = vsyncpa [#allocation4], 0 }
   0x7   :  { %17 = vsyncpa [#allocation4 + $0x1], 0 }
   0x8   :  { %18 = vsyncpa [#allocation9], 0 }
   0x9   :  { %20 = vsyncpa [#allocation9 + $0x1], 0  ;;  %s832_s12 = smov 0   ;;  %s834_s13 = smov 0  }
   0xa   :  { %s836_s14 = smov 0   ;;  %s838_s15 = smov 0  }
   0xb   :  { %s840_s16 = smov 0   ;;  %s842_s17 = smov 0  }
   0xc LB: > { %s518_s18 = sadd.s32 4294967295, %s801_s17   ;;  %s519_s19 = sadd.s32 4294967294, %s801_s17   ;;  %s801_s17 = sphi %s842_s17, %s26_s17   ;;  %s797_s16 = sphi %s840_s16, %s1126_s16   ;;  %s793_s15 = sphi %s838_s15, %s1125_s15   ;;  %s789_s14 = sphi %s836_s14, %s1124_s14   ;;  %s785_s13 = sphi %s834_s13, %s1123_s13   ;;  %s781_s12 = sphi %s832_s12, %s1122_s12  }
   0xd   : > { %s45_s20 = sadd.s32 1, %s797_s16  ;;  %s56_s21 = sadd.s32 1, %s789_s14 }
   0xe   : > { %p47_p0 = scmp.ge.s32.totalorder %s45_s20, 2  ;;  %p63_p1 = scmp.ne.s32.totalorder %s789_s14, %s785_s13 }
   0xf   : > { %p64_p2 = scmp.eq.s32.totalorder %s801_s17, 0  ;;  %p69_p3 = scmp.ne.s32.totalorder %s785_s13, %s781_s12 }
  0x10   : > { %s1128_s20 = smov (%p47_p0, %s45_s20), 0  ;;  %p70_p5 = scmp.eq.s32.totalorder %s518_s18, 0 }
  0x11   : > { %p873_p4 = por %p64_p2, %p63_p1  ;;  %s49_s23 = ssub.s32 %s797_s16, %s1128_s20 }
  0x12   : > { %p129_p6 = scmp.eq.s32.totalorder %s518_s18, 1  ;;  %p54_p7 = scmp.eq.s32.totalorder %s49_s23, 0 }
  0x13   : > { %p879_p8 = por %p70_p5, %p69_p3  ;;  %p135_p10 = scmp.eq.s32.totalorder %s519_s19, 1 }
  0x14   : > { %p883_p9 = por %p129_p6, %p63_p1  ;;  %p567_p13 = scmp.lt.s32.totalorder %s801_s17, 2 }
  0x15   : > { %s1111_s24 = scalar_select %p879_p8, 1, 0 }
  0x16   : > { %s1112_s25 = scalar_select %p883_p9, 1, 0 }
  0x17   : > { %s888_s26 = scalar_select %p54_p7, %s789_s14, %s56_s21  }
  0x18   : > { %p890_p11 = por %p135_p10, %p69_p3  ;;  %s897_s28 = sand.u32 1, %s789_s14  }
  0x19   : > { %s522_s29 = sshll.u32 %s897_s28, 5  ;;  %s541_s30 = sshll.u32 %s797_s16, 10 }
  0x1a   : > { %s1113_s27 = scalar_select %p890_p11, 1, 0 }
  0x1b   : > { %s1114_s0 = sld [smem:[#allocation14_spill]]  ;;  %s189_s7 = scalar_lea.vmem [#allocation2], %s522_s29 }
  0x1c   : > { %s201_s8 = sshll.u32 %s189_s7, 4  ;;  %p914_p0 = pnand %p567_p13, %p873_p4  ;;  %s910_s8 = int_to_ptr.vmem [resolvable:$true] %s201_s8 }
  0x1d   : > { %s186_s10 = scalar_lea.sflag [#allocation3], %s897_s28 }
  0x1e   : > { %p624_p2 = pneg %p914_p0 }
  0x21   : > { %s906_s6 = scalar_lea.hbm %s1114_s0, %s541_s30  ;;  %s627_s21 = scalar_lea.hbm %s1114_s0, 2048 }
  0x22   : > { %s622_s11 = scalar_lea.hbm %s906_s6, 512  ;;  %p628_p4 = scmp.lt.u32.totalorder %s906_s6, %s1114_s0 }
  0x23   : > { %p623_p1 = scmp.ne.s32.totalorder %s906_s6, %s622_s11  ;;  %p629_p6 = scmp.lt.u32.totalorder %s627_s21, %s622_s11 }
  0x24   : > { %p631_p10 = scmp.lt.u32.totalorder %s622_s11, %s906_s6 }
  0x25   : > { %p625_p3 = pnand %p624_p2, %p623_p1  ;;  %p630_p7 = por %p629_p6, %p628_p4 }
  0x27   : > { %p626_p5 = pneg %p625_p3  ;;  %p632_p13 = por %p631_p10, %p630_p7 }
  0x29   : > { %p633_p12 = pnand %p632_p13, %p626_p5 }
  0x2b   : > { %636 = shalt.err (!%p633_p12)
}
  0x2c   : > { %s637_s4 = scalar_lea.vmem %s910_s8, 512  ;;  %s803_s5 = smov [#allocation2]  }
  0x2d   : > { %p638_p1 = scmp.ne.s32.totalorder %s910_s8, %s637_s4  ;;  %s642_s7 = sshll.u32 %s803_s5, 4  ;;  %s643_s7 = int_to_ptr.vmem [resolvable:$false] %s642_s7 }
  0x2e   : > { %s644_s18 = scalar_lea.vmem %s643_s7, 1024  ;;  %p645_p9 = scmp.lt.s32.totalorder %s910_s8, %s643_s7 }
  0x2f   : > { %p640_p3 = pnand %p638_p1, %p624_p2  ;;  %p646_p4 = scmp.lt.s32.totalorder %s644_s18, %s637_s4 }
  0x31   : > { %p641_p11 = pneg %p640_p3  ;;  %p647_p6 = por %p646_p4, %p645_p9 }
  0x33   : > { %p648_p7 = pnand %p647_p6, %p641_p11 }
  0x35   : > { %651 = shalt.err (!%p648_p7)
}
  0x36   : > { %s1107_s11 = smov 512   ;;  %s805_s19 = smov 256  }
  0x37   : > { %s806_s21 = smov 16   ;;  %p528_p9 = scmp.ge.s32.totalorder %s801_s17, 1 }
  0x38   : > { %556 = dma.hbm_to_vmem [thread:$0]  (!%p914_p0), %s906_s6, 512, %s910_s8, %s186_s10, %s1107_s11, %s805_s19, %s806_s21  }
  0x39   : > { %p236_p11 = scmp.lt.s32.totalorder %s801_s17, 3  ;;  %s419_s5 = scalar_lea.hbm %s1103_s1, %s541_s30 }
  0x3a   : > { %s960_s7 = scalar_lea.hbm %s419_s5, 256  ;;  %s215_s18 = scalar_lea.vmem [#allocation5], %s522_s29 }
  0x3b   : > { %p951_p12 = pnand %p528_p9, %p236_p11  ;;  %s228_s0 = sshll.u32 %s215_s18, 4  ;;  %s964_s0 = int_to_ptr.vmem [resolvable:$true] %s228_s0 }
  0x3c   : > { %s212_s6 = scalar_lea.sflag [#allocation6], %s897_s28  ;;  %s682_s8 = scalar_lea.hbm %s419_s5, 768 }
  0x3d   : > { %p653_p5 = scmp.ne.s32.totalorder %s960_s7, %s682_s8  ;;  %s657_s30 = scalar_lea.hbm %s1103_s1, 2048 }
  0x3e   : > { %p658_p1 = scmp.lt.u32.totalorder %s960_s7, %s1103_s1  ;;  %p659_p3 = scmp.lt.u32.totalorder %s657_s30, %s682_s8 }
  0x3f   : > { %p655_p10 = pnand %p653_p5, %p624_p2  ;;  %p661_p6 = scmp.lt.u32.totalorder %s682_s8, %s960_s7 }
  0x40   : > { %p660_p4 = por %p659_p3, %p658_p1 }
  0x41   : > { %p656_p13 = pneg %p655_p10 }
  0x42   : > { %p662_p7 = por %p661_p6, %p660_p4 }
  0x44   : > { %p663_p9 = pnand %p662_p7, %p656_p13 }
  0x46   : > { %666 = shalt.err (!%p663_p9)
}
  0x47   : > { %s667_s29 = scalar_lea.vmem %s964_s0, 512  ;;  %s807_s5 = smov [#allocation5]  }
  0x48   : > { %p668_p11 = scmp.ne.s32.totalorder %s964_s0, %s667_s29  ;;  %s672_s18 = sshll.u32 %s807_s5, 4  ;;  %s673_s18 = int_to_ptr.vmem [resolvable:$false] %s672_s18 }
  0x49   : > { %s674_s11 = scalar_lea.vmem %s673_s18, 1024  ;;  %p675_p8 = scmp.lt.s32.totalorder %s964_s0, %s673_s18 }
  0x4a   : > { %p670_p5 = pnand %p668_p11, %p624_p2  ;;  %p676_p1 = scmp.lt.s32.totalorder %s674_s11, %s667_s29 }
  0x4c   : > { %p671_p10 = pneg %p670_p5  ;;  %p677_p3 = por %p676_p1, %p675_p8 }
  0x4e   : > { %p678_p4 = pnand %p677_p3, %p671_p10 }
  0x50   : > { %681 = shalt.err (!%p678_p4)
}
  0x51   : > { %s1117_s8 = smov 512   ;;  %240 = sbr.rel (%p951_p12) target bundleno = 142 (0x8e), region = 28 }
  0x52   : > { %559 = dma.hbm_to_vmem [thread:$0]  (!%p914_p0), %s960_s7, 512, %s964_s0, %s212_s6, %s1117_s8, %s805_s19, %s806_s21  }
  0x53   : > { %s997_s10 = sand.u32 (!%p951_p12), 1, %s785_s13   ;;  %p1118_p8 = scmp.ne.s32.totalorder (!%p951_p12), %s1111_s24, 0 }
  0x54   : > { %s529_s23 = sshll.u32 (!%p951_p12), %s997_s10, 5  ;;  %s243_s30 = scalar_lea.sflag (!%p951_p12), [#allocation3], %s997_s10 }
  0x55   : > { %s246_s9 = scalar_lea.vmem (!%p951_p12), [#allocation2], %s529_s23 }
  0x58   : > { %764 = dma.done.wait (%p1118_p8), %s243_s30, 512  }
  0x59   : > { %766 = vsyncadd (%p1118_p8), %s243_s30, 4294966784  ;;  %s252_s0 = scalar_lea.sflag [#allocation6], %s997_s10  ;;  %s255_s28 = scalar_lea.vmem [#allocation5], %s529_s23 }
  0x5a   : > { %768 = dma.done.wait (%p1118_p8), %s252_s0, 512  }
  0x5b   : > { %770 = vsyncadd (%p1118_p8), %s252_s0, 4294966784  ;;  %s280_s19 = scalar_lea.vmem [#allocation7], %s529_s23  ;;  %s287_s22 = scalar_lea.vmem [#allocation8], %s529_s23  ;;  %v297_v0 = vld [vmem:[%s246_s9] sm:$0xff]  ;;  %v298_v1 = vld [vmem:[%s246_s9 + $0x8] sm:$0xff] }
  0x5c   : > { %s337_s21 = sshll.u32 %s280_s19, 4  ;;  %s358_s7 = sshll.u32 %s287_s22, 4  ;;  %v299_v2 = vld [vmem:[%s246_s9 + $0x10] sm:$0xff]  ;;  %301 = vst [vmem:[%s280_s19] sm:$0xff] %v297_v0  ;;  %302 = vst [vmem:[%s280_s19 + $0x8] sm:$0xff] %v298_v1  ;;  %v300_v3 = vld [vmem:[%s246_s9 + $0x18] sm:$0xff]  ;;  %s1011_s21 = int_to_ptr.vmem [resolvable:$true] %s337_s21  ;;  %s1013_s7 = int_to_ptr.vmem [resolvable:$true] %s358_s7 }
  0x5d   : > { %s543_s6 = sshll.u32 %s793_s15, 9  ;;  %303 = vst [vmem:[%s280_s19 + $0x10] sm:$0xff] %v299_v2  ;;  %v305_v4 = vld [vmem:[%s255_s28] sm:$0xff]  ;;  %v306_v5 = vld [vmem:[%s255_s28 + $0x8] sm:$0xff]  ;;  %304 = vst [vmem:[%s280_s19 + $0x18] sm:$0xff] %v300_v3  ;;  %s314_s11 = scalar_lea.sflag [#allocation4], %s997_s10 }
  0x5e   : > { %s1018_s5 = scalar_lea.hbm %s1104_s2, %s543_s6  ;;  %s1023_s18 = scalar_lea.hbm %s1105_s3, %s543_s6  ;;  %309 = vst [vmem:[%s287_s22] sm:$0xff] %v305_v4  ;;  %310 = vst [vmem:[%s287_s22 + $0x8] sm:$0xff] %v306_v5  ;;  %v307_v6 = vld [vmem:[%s255_s28 + $0x10] sm:$0xff]  ;;  %v308_v7 = vld [vmem:[%s255_s28 + $0x18] sm:$0xff] }
  0x5f   : > { %311 = vst [vmem:[%s287_s22 + $0x10] sm:$0xff] %v307_v6  ;;  %312 = vst [vmem:[%s287_s22 + $0x18] sm:$0xff] %v308_v7  ;;  %s683_s8 = scalar_lea.vmem %s1011_s21, 512  ;;  %p1119_p2 = scmp.ne.s32.totalorder %s1112_s25, 0 }
  0x60   : > { %p684_p0 = scmp.ne.s32.totalorder %s1011_s21, %s683_s8  ;;  %s808_s23 = smov [#allocation7]  }
  0x61   : > { %s687_s30 = sshll.u32 %s808_s23, 4  ;;  %s688_s30 = int_to_ptr.vmem [resolvable:$false] %s687_s30 }
  0x62   : > { %p685_p12 = pnand %p684_p0, %p1119_p2  ;;  %s689_s9 = scalar_lea.vmem %s688_s30, 1024 }
  0x63   : > { %p690_p6 = scmp.lt.s32.totalorder %s1011_s21, %s688_s30  ;;  %p691_p7 = scmp.lt.s32.totalorder %s689_s9, %s683_s8 }
  0x64   : > { %p686_p13 = pneg %p685_p12 }
  0x65   : > { %p692_p9 = por %p691_p7, %p690_p6 }
  0x67   : > { %p693_p11 = pnand %p692_p9, %p686_p13 }
  0x69   : > { %696 = shalt.err (!%p693_p11)
}
  0x6a   : > { %s697_s0 = scalar_lea.hbm %s1018_s5, 512  ;;  %s701_s22 = scalar_lea.hbm %s1104_s2, 1024 }
  0x6b   : > { %p698_p5 = scmp.ne.s32.totalorder %s1018_s5, %s697_s0  ;;  %p702_p3 = scmp.lt.u32.totalorder %s1018_s5, %s1104_s2 }
  0x6c   : > { %p703_p4 = scmp.lt.u32.totalorder %s701_s22, %s697_s0  ;;  %p705_p0 = scmp.lt.u32.totalorder %s697_s0, %s1018_s5 }
  0x6d   : > { %p699_p10 = pnand %p698_p5, %p1119_p2 }
  0x6e   : > { %p704_p8 = por %p703_p4, %p702_p3 }
  0x6f   : > { %p700_p1 = pneg %p699_p10 }
  0x70   : > { %p706_p12 = por %p705_p0, %p704_p8 }
  0x72   : > { %p707_p13 = pnand %p706_p12, %p700_p1 }
  0x74   : > { %710 = shalt.err (!%p707_p13)
}
  0x75   : > { %s809_s29 = smov 256   ;;  %s810_s15 = smov 16  }
  0x76   : > { %549 = dma.vmem_to_hbm [thread:$0]  (%p1119_p2), %s1011_s21, 512, %s1018_s5, %s314_s11, %s809_s29, %s809_s29, %s810_s15  }
  0x77   : > { %s319_s24 = scalar_lea.sflag [#allocation9], %s997_s10  ;;  %s711_s8 = scalar_lea.vmem %s1013_s7, 512 }
  0x78   : > { %p712_p6 = scmp.ne.s32.totalorder %s1013_s7, %s711_s8  ;;  %s811_s23 = smov [#allocation8]  }
  0x79   : > { %s715_s30 = sshll.u32 %s811_s23, 4  ;;  %s716_s30 = int_to_ptr.vmem [resolvable:$false] %s715_s30 }
  0x7a   : > { %p713_p7 = pnand %p712_p6, %p1119_p2  ;;  %s717_s9 = scalar_lea.vmem %s716_s30, 1024 }
  0x7b   : > { %p718_p11 = scmp.lt.s32.totalorder %s1013_s7, %s716_s30  ;;  %p719_p5 = scmp.lt.s32.totalorder %s717_s9, %s711_s8 }
  0x7c   : > { %p714_p9 = pneg %p713_p7 }
  0x7d   : > { %p720_p10 = por %p719_p5, %p718_p11 }
  0x7f   : > { %p721_p1 = pnand %p720_p10, %p714_p9 }
  0x81   : > { %724 = shalt.err (!%p721_p1)
}
  0x82   : > { %s725_s21 = scalar_lea.hbm %s1023_s18, 512  ;;  %s729_s0 = scalar_lea.hbm %s1105_s3, 1024 }
  0x83   : > { %p726_p3 = scmp.ne.s32.totalorder %s1023_s18, %s725_s21  ;;  %p730_p0 = scmp.lt.u32.totalorder %s1023_s18, %s1105_s3 }
  0x84   : > { %p731_p12 = scmp.lt.u32.totalorder %s729_s0, %s725_s21  ;;  %p733_p6 = scmp.lt.u32.totalorder %s725_s21, %s1023_s18 }
  0x85   : > { %p727_p4 = pnand %p726_p3, %p1119_p2 }
  0x86   : > { %p732_p13 = por %p731_p12, %p730_p0 }
  0x87   : > { %p728_p8 = pneg %p727_p4 }
  0x88   : > { %p734_p7 = por %p733_p6, %p732_p13 }
  0x8a   : > { %p735_p9 = pnand %p734_p7, %p728_p8 }
  0x8c   : > { %738 = shalt.err (!%p735_p9)
}
  0x8d   : > { %550 = dma.vmem_to_hbm [thread:$0]  (%p1119_p2), %s1013_s7, 512, %s1023_s18, %s319_s24, %s809_s29, %s809_s29, %s810_s15  }
  0x8e PF: > { %s373_s22 = sand.u32 1, %s781_s12   ;;  %p1120_p11 = scmp.ne.s32.totalorder %s1113_s27, 0 }
  0x8f   : > { %p1121_p5 = scmp.ge.s32.totalorder %s801_s17, 2  ;;  %s374_s6 = scalar_lea.sflag [#allocation4], %s373_s22 }
  0x91   : > { %p561_p10 = pnand %p1121_p5, %p1120_p11 }
  0x93   : > { %772 = dma.done.wait (!%p561_p10), %s374_s6, 512  }
  0x94   : > { %774 = vsyncadd (!%p561_p10), %s374_s6, 4294966784  ;;  %s383_s25 = scalar_lea.sflag [#allocation9], %s373_s22 }
  0x95   : > { %776 = dma.done.wait (!%p561_p10), %s383_s25, 512  }
  0x96   : > { %778 = vsyncadd (!%p561_p10), %s383_s25, 4294966784  ;;  %s26_s17 = sadd.s32 1, %s801_s17   ;;  %s1122_s12 = smov %s785_s13 }
  0x97   : > { %p23_p1 = scmp.ge.s32.totalorder %s26_s17, 4   ;;  %s1123_s13 = smov %s789_s14 }
  0x98   : > { %s1124_s14 = smov %s888_s26  ;;  %s1125_s15 = smov %s797_s16 }
  0x99   : > { %s1126_s16 = smov %s1128_s20  ;;  %25 = sbr.rel (!%p23_p1) target bundleno = 12 (0xc), region = 103 }
  0xa0   :  { %388 = vsyncpa [#allocation3], 1 }
  0xa1   :  { %390 = vsyncpa [#allocation3 + $0x1], 1 }
  0xa2   :  { %391 = vsyncpa [#allocation6], 1 }
  0xa3   :  { %393 = vsyncpa [#allocation6 + $0x1], 1 }
  0xa4   :  { %394 = vsyncpa [#allocation4], 1 }
  0xa5   :  { %396 = vsyncpa [#allocation4 + $0x1], 1 }
  0xa6   :  { %397 = vsyncpa [#allocation9], 1 }
  0xa7   :  { %399 = vsyncpa [#allocation9 + $0x1], 1 }

</bundles_post_ra>
